<compile_context>
chip_gen: v5e
topology: v5e:2x2
jax: 0.10.0
libtpu: 0.0.40
codegen_flags: <defaults>
</compile_context>

<pallas_src>
import numpy as np

import jax
import jax.numpy as jnp
from jax.experimental import pallas as pl
from jax.experimental.pallas import tpu as pltpu

EPS = 1e-5


# ---------------------------------------------------------------------------
# Static helpers (run once, outside the per-forward path)
# ---------------------------------------------------------------------------
def _make_tap_masks(H, W):
    """(8, H*W) f32 border-validity masks for the 8 non-centre 3x3 taps."""
    rows = []
    for ky in range(3):
        for kx in range(3):
            if ky == 1 and kx == 1:          # centre tap: mask is all ones
                continue
            dy, dx = ky - 1, kx - 1
            h_ok = (np.arange(H) + dy >= 0) & (np.arange(H) + dy < H)
            w_ok = (np.arange(W) + dx >= 0) & (np.arange(W) + dx < W)
            rows.append((h_ok[:, None] & w_ok[None, :])
                        .astype(np.float32).reshape(H * W))
    return jnp.asarray(np.stack(rows))


def pack_dense_block_params(params, in_channel, H, W):
    """One-time repack: stack per-layer params, channel-pad to C_pad.

    params: list of (gamma, beta, conv_w_OIHW, conv_b) per conv_block.
    Returns a dict of stacked arrays consumable by dense_block_forward.
    """
    L = len(params)
    growth = params[0][3].shape[0]
    c_pad = in_channel + (L - 1) * growth          # max channels any conv reads
    c_pad = ((c_pad + 15) // 16) * 16              # bf16 slab sublane alignment

    gammas, betas, ws, bs = [], [], [], []
    for li, (gamma, beta, w, b) in enumerate(params):
        cin = in_channel + li * growth
        assert w.shape == (growth, cin, 3, 3)
        pad_c = c_pad - cin
        gammas.append(jnp.pad(gamma.astype(jnp.float32),
                              (0, pad_c)).reshape(c_pad, 1))
        betas.append(jnp.pad(beta.astype(jnp.float32),
                             (0, pad_c)).reshape(c_pad, 1))
        # OIHW -> (O, ky, kx, ci), zero-pad ci -> C_pad, flatten K = t*C_pad+ci
        wt = jnp.transpose(w.astype(jnp.float32), (0, 2, 3, 1))
        wt = jnp.pad(wt, ((0, 0), (0, 0), (0, 0), (0, pad_c)))
        ws.append(wt.reshape(growth, 9 * c_pad).astype(jnp.bfloat16))
        bs.append(b.astype(jnp.float32).reshape(growth, 1))

    return dict(gamma=jnp.stack(gammas), beta=jnp.stack(betas),
                w=jnp.stack(ws), b=jnp.stack(bs),
                masks=_make_tap_masks(H, W))


# ---------------------------------------------------------------------------
# Fused DenseBlock kernel: grid = (num_layers, batch)
# ---------------------------------------------------------------------------
def _make_dense_block_kernel(N, C0, C_pad, growth, W, HW, L):
    inv_cnt = 1.0 / float(N * HW)

    def kernel(x_ref, m_ref, gamma_ref, beta_ref, w_ref, b_ref,
               y_ref, act, sum_sc, ssq_sc, slab):
        # x_ref     : (N, C0, HW)       whole input batch (fetched once)
        # m_ref     : (8, HW)           border masks, centre tap dropped
        # gamma/beta: (1, C_pad, 1)     this layer's BN affine (zero-padded)
        # w_ref     : (1, growth, 9*C_pad)  bf16, tap-major / channel-minor
        # b_ref     : (1, growth, 1)
        # y_ref     : (1, growth, HW)   new channels of image n -> HBM
        # act       : (N, C_pad, HW)    VMEM-resident activations (all images)
        # sum/ssq_sc: (C_pad, 1)        cached per-channel batch statistics
        # slab      : (9*C_pad, HW)     bf16 im2col scratch
        l = pl.program_id(0)
        n = pl.program_id(1)

        # ---- one-time init: stage the input batch into the resident buffer
        #      and seed the per-channel batch statistics.
        @pl.when(jnp.logical_and(l == 0, n == 0))
        def _init():
            act[...] = jnp.zeros_like(act)
            sum_sc[...] = jnp.zeros_like(sum_sc)
            ssq_sc[...] = jnp.zeros_like(ssq_sc)
            x0 = x_ref[...]                                       # (N, C0, HW)
            act[:, 0:C0, :] = x0
            sum_sc[0:C0, :] = jnp.sum(
                jnp.sum(x0, axis=2, keepdims=True), axis=0)       # (C0, 1)
            ssq_sc[0:C0, :] = jnp.sum(
                jnp.sum(x0 * x0, axis=2, keepdims=True), axis=0)

        # ---- BatchNorm (training-mode batch stats) + ReLU, f32 on the VPU.
        # Padded channels have gamma = beta = 0 => scale = shift = 0 and zero
        # activations, so they contribute exact zeros to the conv below.
        xs = act[n]                                               # (C_pad, HW)
        mean = sum_sc[...] * inv_cnt
        var = jnp.maximum(ssq_sc[...] * inv_cnt - mean * mean, 0.0)
        scale = gamma_ref[0] * jax.lax.rsqrt(var + EPS)
        shift = beta_ref[0] - mean * scale
        a = jnp.maximum(xs * scale + shift, 0.0)                  # (C_pad, HW)

        # ---- im2col slab built straight into bf16 VMEM scratch.
        # Row t*C_pad + ci at column h*W + w holds a[ci, h+ky-1, w+kx-1]
        # (zero outside the image); centre tap needs neither roll nor mask.
        for ky in range(3):
            for kx in range(3):
                t = 3 * ky + kx
                rows = slice(t * C_pad, (t + 1) * C_pad)
                if t == 4:
                    slab[rows, :] = a.astype(jnp.bfloat16)
                else:
                    off = (ky - 1) * W + (kx - 1)
                    rolled = pltpu.roll(a, shift=(-off) % HW, axis=1)
                    m = t if t < 4 else t - 1
                    slab[rows, :] = (rolled * m_ref[m:m + 1, :]
                                     ).astype(jnp.bfloat16)

        # ---- all 9 taps in a single MXU matmul, bf16 in / f32 accumulate.
        out = jnp.dot(w_ref[0], slab[...],
                      preferred_element_type=jnp.float32)         # (growth, HW)
        out = out + b_ref[0]

        y_ref[0] = out.astype(y_ref.dtype)

        # ---- feed the next layer: append the new channels to the resident
        #      activation buffer and extend the cached batch statistics.
        @pl.when(l + 1 < L)
        def _carry():
            c_off = pl.multiple_of(C0 + l * growth, 8)
            act[n, pl.ds(c_off, growth), :] = out
            sum_sc[pl.ds(c_off, growth), :] += jnp.sum(
                out, axis=1, keepdims=True)
            ssq_sc[pl.ds(c_off, growth), :] += jnp.sum(
                out * out, axis=1, keepdims=True)

    return kernel


def _dense_block_call(N, C0, C_pad, growth, W, HW, L):
    return pl.pallas_call(
        _make_dense_block_kernel(N, C0, C_pad, growth, W, HW, L),
        out_shape=jax.ShapeDtypeStruct((N, L * growth, HW), jnp.float32),
        grid=(L, N),
        in_specs=[
            pl.BlockSpec((N, C0, HW), lambda l, n: (0, 0, 0)),          # input
            pl.BlockSpec((8, HW), lambda l, n: (0, 0)),                 # masks
            pl.BlockSpec((1, C_pad, 1), lambda l, n: (l, 0, 0)),        # gamma
            pl.BlockSpec((1, C_pad, 1), lambda l, n: (l, 0, 0)),        # beta
            pl.BlockSpec((1, growth, 9 * C_pad), lambda l, n: (l, 0, 0)),  # W
            pl.BlockSpec((1, growth, 1), lambda l, n: (l, 0, 0)),       # bias
        ],
        out_specs=pl.BlockSpec((1, growth, HW), lambda l, n: (n, l, 0)),
        scratch_shapes=[
            pltpu.VMEM((N, C_pad, HW), jnp.float32),    # resident activations
            pltpu.VMEM((C_pad, 1), jnp.float32),        # per-channel sum
            pltpu.VMEM((C_pad, 1), jnp.float32),        # per-channel sum-of-sq
            pltpu.VMEM((9 * C_pad, HW), jnp.bfloat16),  # im2col slab
        ],
        compiler_params=pltpu.CompilerParams(
            dimension_semantics=("arbitrary", "arbitrary")),
    )


# ---------------------------------------------------------------------------
# DenseBlock forward
# ---------------------------------------------------------------------------
def dense_block_forward(x_nchw, packed):
    """packed: output of pack_dense_block_params (stacked per-layer params)."""
    N, C0, H, W = x_nchw.shape
    HW = H * W
    L, growth = packed["w"].shape[0], packed["w"].shape[1]
    C_pad = packed["gamma"].shape[1]

    assert C0 % 8 == 0 and growth % 8 == 0 and HW % 128 == 0, (
        "demo requires 8-aligned channels and 128-aligned spatial size")
    assert C0 + (L - 1) * growth <= C_pad
    assert packed["masks"].shape == (8, HW)

    x_flat = x_nchw.astype(jnp.float32).reshape(N, C0, HW)
    call = _dense_block_call(N, C0, C_pad, growth, W, HW, L)
    y_new = call(x_flat, packed["masks"], packed["gamma"], packed["beta"],
                 packed["w"], packed["b"])                 # (N, L*growth, HW)

    out = jnp.concatenate([x_flat, y_new], axis=1)         # dense concat (once)
    return out.reshape(N, C0 + L * growth, H, W)


# ---------------------------------------------------------------------------
# Pure-JAX reference (for correctness check)
# ---------------------------------------------------------------------------
def ref_forward(x_nchw, params, conv_dtype=jnp.float32):
    x = x_nchw.astype(jnp.float32)
    for gamma, beta, w, b in params:
        mean = x.mean(axis=(0, 2, 3))
        var = x.var(axis=(0, 2, 3))               # biased (training-mode BN)
        scale = gamma / jnp.sqrt(var + EPS)
        shift = beta - mean * scale
        a = jnp.maximum(
            x * scale[None, :, None, None] + shift[None, :, None, None], 0.0)
        y = jax.lax.conv_general_dilated(
            a.astype(conv_dtype), w.astype(conv_dtype),
            window_strides=(1, 1), padding="SAME",
            dimension_numbers=("NCHW", "OIHW", "NCHW"),
            preferred_element_type=jnp.float32)
        y = y + b[None, :, None, None]
        x = jnp.concatenate([x, y], axis=1)
    return x


if __name__ == "__main__":
    num_block, in_channel, growth = 2, 8, 8
    N, H, W = 2, 16, 16

    key = jax.random.PRNGKey(0)
    params = []
    for i in range(num_block):
        cin = in_channel + i * growth
        key, k1, k2, k3, k4 = jax.random.split(key, 5)
        gamma = 1.0 + 0.1 * jax.random.normal(k1, (cin,), jnp.float32)
        beta = 0.1 * jax.random.normal(k2, (cin,), jnp.float32)
        w = 0.1 * jax.random.normal(k3, (growth, cin, 3, 3), jnp.float32)
        b = 0.1 * jax.random.normal(k4, (growth,), jnp.float32)
        params.append((gamma, beta, w, b))

    key, kx = jax.random.split(key)
    x = jax.random.normal(kx, (N, in_channel, H, W), jnp.float32)

    # One-time parameter repack (hoisted out of the per-forward path).
    packed = pack_dense_block_params(params, in_channel, H, W)

    fwd = jax.jit(dense_block_forward)
    out = jax.block_until_ready(fwd(x, packed))

    expected_channels = in_channel + num_block * growth
    assert out.shape == (N, expected_channels, H, W), out.shape

    # Tight check vs. a reference that mirrors the kernel's bf16 MXU inputs.
    ref_bf16 = jax.block_until_ready(ref_forward(x, params, jnp.bfloat16))
    assert jnp.allclose(out, ref_bf16, atol=1e-2, rtol=1e-2), (
        float(jnp.max(jnp.abs(out - ref_bf16))))

    # Looser check vs. the pure-f32 reference (tolerance accounts for the
    # intentional bf16 cast of conv inputs on the MXU).
    ref_f32 = jax.block_until_ready(ref_forward(x, params, jnp.float32))
    assert jnp.allclose(out, ref_f32, atol=5e-2, rtol=5e-2), (
        float(jnp.max(jnp.abs(out - ref_f32))))

    print("KERNEL_OK")
</pallas_src>

<mosaic_0001>
module attributes {stable_mosaic.version = 11 : i64} {
  func.func @kernel(%arg0: i32, %arg1: i32, %arg2: memref<2x8x256xf32, #tpu.memory_space<vmem>>, %arg3: memref<8x256xf32, #tpu.memory_space<vmem>>, %arg4: memref<1x16x1xf32, #tpu.memory_space<vmem>>, %arg5: memref<1x16x1xf32, #tpu.memory_space<vmem>>, %arg6: memref<1x8x144xbf16, #tpu.memory_space<vmem>>, %arg7: memref<1x8x1xf32, #tpu.memory_space<vmem>>, %arg8: memref<1x8x256xf32, #tpu.memory_space<vmem>>, %arg9: memref<2x16x256xf32, #tpu.memory_space<vmem>>, %arg10: memref<16x1xf32, #tpu.memory_space<vmem>>, %arg11: memref<16x1xf32, #tpu.memory_space<vmem>>, %arg12: memref<144x256xbf16, #tpu.memory_space<vmem>>) attributes {dimension_semantics = [#tpu.dimension_semantics<arbitrary>, #tpu.dimension_semantics<arbitrary>], iteration_bounds = array<i64: 2, 2>, scalar_prefetch = 0 : i64, scratch_operands = 4 : i64, tpu.core_type = #tpu.core_type<tc>, window_params = [{pipeline_mode = #tpu.pipeline_mode<synchronous>, transform_indices = @transform_0, window_bounds = array<i64: 2, 8, 256>}, {pipeline_mode = #tpu.pipeline_mode<synchronous>, transform_indices = @transform_1, window_bounds = array<i64: 8, 256>}, {transform_indices = @transform_2, window_bounds = array<i64: 1, 16, 1>}, {transform_indices = @transform_3, window_bounds = array<i64: 1, 16, 1>}, {transform_indices = @transform_4, window_bounds = array<i64: 1, 8, 144>}, {transform_indices = @transform_5, window_bounds = array<i64: 1, 8, 1>}, {transform_indices = @transform_6, window_bounds = array<i64: 1, 8, 256>}]} {
    %c0_i32 = arith.constant 0 : i32
    %0 = arith.cmpi eq, %arg0, %c0_i32 : i32
    %c0_i32_0 = arith.constant 0 : i32
    %1 = arith.cmpi eq, %arg1, %c0_i32_0 : i32
    %2 = arith.andi %0, %1 : i1
    %3 = arith.extui %2 : i1 to i32
    %c0_i32_1 = arith.constant 0 : i32
    %4 = arith.cmpi ne, %3, %c0_i32_1 : i32
    scf.if %4 {
      %cst_50 = arith.constant 0.000000e+00 : f32
      %99 = vector.broadcast %cst_50 : f32 to vector<2x16x256xf32>
      %c0_51 = arith.constant 0 : index
      %c0_52 = arith.constant 0 : index
      %c0_53 = arith.constant 0 : index
      %100 = vector.load %arg9[%c0_51, %c0_52, %c0_53] : memref<2x16x256xf32, #tpu.memory_space<vmem>>, vector<2x16x256xf32>
      tpu.vector_store %arg9[%c0_51, %c0_52, %c0_53], %99 {strides = array<i32>} : memref<2x16x256xf32, #tpu.memory_space<vmem>>, vector<2x16x256xf32>,
      %cst_54 = arith.constant 0.000000e+00 : f32
      %101 = vector.broadcast %cst_54 : f32 to vector<16x1xf32>
      %c0_55 = arith.constant 0 : index
      %c0_56 = arith.constant 0 : index
      %102 = vector.load %arg10[%c0_55, %c0_56] : memref<16x1xf32, #tpu.memory_space<vmem>>, vector<16x1xf32>
      tpu.vector_store %arg10[%c0_55, %c0_56], %101 {strides = array<i32>} : memref<16x1xf32, #tpu.memory_space<vmem>>, vector<16x1xf32>,
      %cst_57 = arith.constant 0.000000e+00 : f32
      %103 = vector.broadcast %cst_57 : f32 to vector<16x1xf32>
      %c0_58 = arith.constant 0 : index
      %c0_59 = arith.constant 0 : index
      %104 = vector.load %arg11[%c0_58, %c0_59] : memref<16x1xf32, #tpu.memory_space<vmem>>, vector<16x1xf32>
      tpu.vector_store %arg11[%c0_58, %c0_59], %103 {strides = array<i32>} : memref<16x1xf32, #tpu.memory_space<vmem>>, vector<16x1xf32>,
      %c0_60 = arith.constant 0 : index
      %c0_61 = arith.constant 0 : index
      %c0_62 = arith.constant 0 : index
      %105 = vector.load %arg2[%c0_60, %c0_61, %c0_62] : memref<2x8x256xf32, #tpu.memory_space<vmem>>, vector<2x8x256xf32>
      %c0_63 = arith.constant 0 : index
      %c0_64 = arith.constant 0 : index
      %c0_65 = arith.constant 0 : index
      %106 = vector.load %arg9[%c0_63, %c0_64, %c0_65] : memref<2x16x256xf32, #tpu.memory_space<vmem>>, vector<2x8x256xf32>
      tpu.vector_store %arg9[%c0_63, %c0_64, %c0_65], %105 {strides = array<i32>} : memref<2x16x256xf32, #tpu.memory_space<vmem>>, vector<2x8x256xf32>,
      %cst_66 = arith.constant dense<0.000000e+00> : vector<2x8xf32>
      %107 = vector.multi_reduction <add>, %105, %cst_66 [2] : vector<2x8x256xf32> to vector<2x8xf32>
      %108 = vector.shape_cast %107 : vector<2x8xf32> to vector<2x8x1xf32>
      %cst_67 = arith.constant dense<0.000000e+00> : vector<8x1xf32>
      %109 = vector.multi_reduction <add>, %108, %cst_67 [0] : vector<2x8x1xf32> to vector<8x1xf32>
      %c0_68 = arith.constant 0 : index
      %c0_69 = arith.constant 0 : index
      %110 = vector.load %arg10[%c0_68, %c0_69] : memref<16x1xf32, #tpu.memory_space<vmem>>, vector<8x1xf32>
      tpu.vector_store %arg10[%c0_68, %c0_69], %109 {strides = array<i32>} : memref<16x1xf32, #tpu.memory_space<vmem>>, vector<8x1xf32>,
      %111 = arith.mulf %105, %105 : vector<2x8x256xf32>
      %cst_70 = arith.constant dense<0.000000e+00> : vector<2x8xf32>
      %112 = vector.multi_reduction <add>, %111, %cst_70 [2] : vector<2x8x256xf32> to vector<2x8xf32>
      %113 = vector.shape_cast %112 : vector<2x8xf32> to vector<2x8x1xf32>
      %cst_71 = arith.constant dense<0.000000e+00> : vector<8x1xf32>
      %114 = vector.multi_reduction <add>, %113, %cst_71 [0] : vector<2x8x1xf32> to vector<8x1xf32>
      %c0_72 = arith.constant 0 : index
      %c0_73 = arith.constant 0 : index
      %115 = vector.load %arg11[%c0_72, %c0_73] : memref<16x1xf32, #tpu.memory_space<vmem>>, vector<8x1xf32>
      tpu.vector_store %arg11[%c0_72, %c0_73], %114 {strides = array<i32>} : memref<16x1xf32, #tpu.memory_space<vmem>>, vector<8x1xf32>,
    } else {
    }
    %5 = arith.index_cast %arg1 : i32 to index
    %c0 = arith.constant 0 : index
    %c0_2 = arith.constant 0 : index
    %6 = vector.load %arg9[%5, %c0, %c0_2] : memref<2x16x256xf32, #tpu.memory_space<vmem>>, vector<1x16x256xf32>
    %7 = vector.shape_cast %6 : vector<1x16x256xf32> to vector<16x256xf32>
    %c0_3 = arith.constant 0 : index
    %c0_4 = arith.constant 0 : index
    %8 = vector.load %arg10[%c0_3, %c0_4] : memref<16x1xf32, #tpu.memory_space<vmem>>, vector<16x1xf32>
    %cst = arith.constant 0.001953125 : f32
    %9 = vector.broadcast %cst : f32 to vector<16x1xf32>
    %10 = arith.mulf %8, %9 : vector<16x1xf32>
    %c0_5 = arith.constant 0 : index
    %c0_6 = arith.constant 0 : index
    %11 = vector.load %arg11[%c0_5, %c0_6] : memref<16x1xf32, #tpu.memory_space<vmem>>, vector<16x1xf32>
    %cst_7 = arith.constant 0.001953125 : f32
    %12 = vector.broadcast %cst_7 : f32 to vector<16x1xf32>
    %13 = arith.mulf %11, %12 : vector<16x1xf32>
    %14 = arith.mulf %10, %10 : vector<16x1xf32>
    %15 = arith.subf %13, %14 : vector<16x1xf32>
    %cst_8 = arith.constant 0.000000e+00 : f32
    %16 = vector.broadcast %cst_8 : f32 to vector<16x1xf32>
    %17 = arith.maximumf %15, %16 : vector<16x1xf32>
    %c0_9 = arith.constant 0 : index
    %c0_10 = arith.constant 0 : index
    %c0_11 = arith.constant 0 : index
    %18 = vector.load %arg4[%c0_9, %c0_10, %c0_11] : memref<1x16x1xf32, #tpu.memory_space<vmem>>, vector<1x16x1xf32>
    %19 = vector.shape_cast %18 : vector<1x16x1xf32> to vector<16x1xf32>
    %cst_12 = arith.constant 9.99999974E-6 : f32
    %20 = vector.broadcast %cst_12 : f32 to vector<16x1xf32>
    %21 = arith.addf %17, %20 : vector<16x1xf32>
    %22 = math.rsqrt %21 : vector<16x1xf32>
    %23 = arith.mulf %19, %22 : vector<16x1xf32>
    %c0_13 = arith.constant 0 : index
    %c0_14 = arith.constant 0 : index
    %c0_15 = arith.constant 0 : index
    %24 = vector.load %arg5[%c0_13, %c0_14, %c0_15] : memref<1x16x1xf32, #tpu.memory_space<vmem>>, vector<1x16x1xf32>
    %25 = vector.shape_cast %24 : vector<1x16x1xf32> to vector<16x1xf32>
    %26 = arith.mulf %10, %23 : vector<16x1xf32>
    %27 = arith.subf %25, %26 : vector<16x1xf32>
    %28 = vector.broadcast %23 : vector<16x1xf32> to vector<16x256xf32>
    %29 = arith.mulf %7, %28 : vector<16x256xf32>
    %30 = vector.broadcast %27 : vector<16x1xf32> to vector<16x256xf32>
    %31 = arith.addf %29, %30 : vector<16x256xf32>
    %cst_16 = arith.constant 0.000000e+00 : f32
    %32 = vector.broadcast %cst_16 : f32 to vector<16x256xf32>
    %33 = arith.maximumf %31, %32 : vector<16x256xf32>
    %c17_i32 = arith.constant 17 : i32
    %34 = tpu.dynamic_rotate %33 by %c17_i32 dim 1 : vector<16x256xf32>, i32 -> vector<16x256xf32>
    %c0_17 = arith.constant 0 : index
    %c0_18 = arith.constant 0 : index
    %35 = vector.load %arg3[%c0_17, %c0_18] : memref<8x256xf32, #tpu.memory_space<vmem>>, vector<1x256xf32>
    %36 = vector.broadcast %35 : vector<1x256xf32> to vector<16x256xf32>
    %37 = arith.mulf %34, %36 : vector<16x256xf32>
    %38 = arith.truncf %37 : vector<16x256xf32> to vector<16x256xbf16>
    %c0_19 = arith.constant 0 : index
    %c0_20 = arith.constant 0 : index
    %39 = vector.load %arg12[%c0_19, %c0_20] : memref<144x256xbf16, #tpu.memory_space<vmem>>, vector<16x256xbf16>
    tpu.vector_store %arg12[%c0_19, %c0_20], %38 {strides = array<i32>} : memref<144x256xbf16, #tpu.memory_space<vmem>>, vector<16x256xbf16>,
    %c16_i32 = arith.constant 16 : i32
    %40 = tpu.dynamic_rotate %33 by %c16_i32 dim 1 : vector<16x256xf32>, i32 -> vector<16x256xf32>
    %c1 = arith.constant 1 : index
    %c0_21 = arith.constant 0 : index
    %41 = vector.load %arg3[%c1, %c0_21] : memref<8x256xf32, #tpu.memory_space<vmem>>, vector<1x256xf32>
    %42 = vector.broadcast %41 : vector<1x256xf32> to vector<16x256xf32>
    %43 = arith.mulf %40, %42 : vector<16x256xf32>
    %44 = arith.truncf %43 : vector<16x256xf32> to vector<16x256xbf16>
    %c16 = arith.constant 16 : index
    %c0_22 = arith.constant 0 : index
    %45 = vector.load %arg12[%c16, %c0_22] : memref<144x256xbf16, #tpu.memory_space<vmem>>, vector<16x256xbf16>
    tpu.vector_store %arg12[%c16, %c0_22], %44 {strides = array<i32>} : memref<144x256xbf16, #tpu.memory_space<vmem>>, vector<16x256xbf16>,
    %c15_i32 = arith.constant 15 : i32
    %46 = tpu.dynamic_rotate %33 by %c15_i32 dim 1 : vector<16x256xf32>, i32 -> vector<16x256xf32>
    %c2 = arith.constant 2 : index
    %c0_23 = arith.constant 0 : index
    %47 = vector.load %arg3[%c2, %c0_23] : memref<8x256xf32, #tpu.memory_space<vmem>>, vector<1x256xf32>
    %48 = vector.broadcast %47 : vector<1x256xf32> to vector<16x256xf32>
    %49 = arith.mulf %46, %48 : vector<16x256xf32>
    %50 = arith.truncf %49 : vector<16x256xf32> to vector<16x256xbf16>
    %c32 = arith.constant 32 : index
    %c0_24 = arith.constant 0 : index
    %51 = vector.load %arg12[%c32, %c0_24] : memref<144x256xbf16, #tpu.memory_space<vmem>>, vector<16x256xbf16>
    tpu.vector_store %arg12[%c32, %c0_24], %50 {strides = array<i32>} : memref<144x256xbf16, #tpu.memory_space<vmem>>, vector<16x256xbf16>,
    %c1_i32 = arith.constant 1 : i32
    %52 = tpu.dynamic_rotate %33 by %c1_i32 dim 1 : vector<16x256xf32>, i32 -> vector<16x256xf32>
    %c3 = arith.constant 3 : index
    %c0_25 = arith.constant 0 : index
    %53 = vector.load %arg3[%c3, %c0_25] : memref<8x256xf32, #tpu.memory_space<vmem>>, vector<1x256xf32>
    %54 = vector.broadcast %53 : vector<1x256xf32> to vector<16x256xf32>
    %55 = arith.mulf %52, %54 : vector<16x256xf32>
    %56 = arith.truncf %55 : vector<16x256xf32> to vector<16x256xbf16>
    %c48 = arith.constant 48 : index
    %c0_26 = arith.constant 0 : index
    %57 = vector.load %arg12[%c48, %c0_26] : memref<144x256xbf16, #tpu.memory_space<vmem>>, vector<16x256xbf16>
    tpu.vector_store %arg12[%c48, %c0_26], %56 {strides = array<i32>} : memref<144x256xbf16, #tpu.memory_space<vmem>>, vector<16x256xbf16>,
    %58 = arith.truncf %33 : vector<16x256xf32> to vector<16x256xbf16>
    %c64 = arith.constant 64 : index
    %c0_27 = arith.constant 0 : index
    %59 = vector.load %arg12[%c64, %c0_27] : memref<144x256xbf16, #tpu.memory_space<vmem>>, vector<16x256xbf16>
    tpu.vector_store %arg12[%c64, %c0_27], %58 {strides = array<i32>} : memref<144x256xbf16, #tpu.memory_space<vmem>>, vector<16x256xbf16>,
    %c255_i32 = arith.constant 255 : i32
    %60 = tpu.dynamic_rotate %33 by %c255_i32 dim 1 : vector<16x256xf32>, i32 -> vector<16x256xf32>
    %c4 = arith.constant 4 : index
    %c0_28 = arith.constant 0 : index
    %61 = vector.load %arg3[%c4, %c0_28] : memref<8x256xf32, #tpu.memory_space<vmem>>, vector<1x256xf32>
    %62 = vector.broadcast %61 : vector<1x256xf32> to vector<16x256xf32>
    %63 = arith.mulf %60, %62 : vector<16x256xf32>
    %64 = arith.truncf %63 : vector<16x256xf32> to vector<16x256xbf16>
    %c80 = arith.constant 80 : index
    %c0_29 = arith.constant 0 : index
    %65 = vector.load %arg12[%c80, %c0_29] : memref<144x256xbf16, #tpu.memory_space<vmem>>, vector<16x256xbf16>
    tpu.vector_store %arg12[%c80, %c0_29], %64 {strides = array<i32>} : memref<144x256xbf16, #tpu.memory_space<vmem>>, vector<16x256xbf16>,
    %c241_i32 = arith.constant 241 : i32
    %66 = tpu.dynamic_rotate %33 by %c241_i32 dim 1 : vector<16x256xf32>, i32 -> vector<16x256xf32>
    %c5 = arith.constant 5 : index
    %c0_30 = arith.constant 0 : index
    %67 = vector.load %arg3[%c5, %c0_30] : memref<8x256xf32, #tpu.memory_space<vmem>>, vector<1x256xf32>
    %68 = vector.broadcast %67 : vector<1x256xf32> to vector<16x256xf32>
    %69 = arith.mulf %66, %68 : vector<16x256xf32>
    %70 = arith.truncf %69 : vector<16x256xf32> to vector<16x256xbf16>
    %c96 = arith.constant 96 : index
    %c0_31 = arith.constant 0 : index
    %71 = vector.load %arg12[%c96, %c0_31] : memref<144x256xbf16, #tpu.memory_space<vmem>>, vector<16x256xbf16>
    tpu.vector_store %arg12[%c96, %c0_31], %70 {strides = array<i32>} : memref<144x256xbf16, #tpu.memory_space<vmem>>, vector<16x256xbf16>,
    %c240_i32 = arith.constant 240 : i32
    %72 = tpu.dynamic_rotate %33 by %c240_i32 dim 1 : vector<16x256xf32>, i32 -> vector<16x256xf32>
    %c6 = arith.constant 6 : index
    %c0_32 = arith.constant 0 : index
    %73 = vector.load %arg3[%c6, %c0_32] : memref<8x256xf32, #tpu.memory_space<vmem>>, vector<1x256xf32>
    %74 = vector.broadcast %73 : vector<1x256xf32> to vector<16x256xf32>
    %75 = arith.mulf %72, %74 : vector<16x256xf32>
    %76 = arith.truncf %75 : vector<16x256xf32> to vector<16x256xbf16>
    %c112 = arith.constant 112 : index
    %c0_33 = arith.constant 0 : index
    %77 = vector.load %arg12[%c112, %c0_33] : memref<144x256xbf16, #tpu.memory_space<vmem>>, vector<16x256xbf16>
    tpu.vector_store %arg12[%c112, %c0_33], %76 {strides = array<i32>} : memref<144x256xbf16, #tpu.memory_space<vmem>>, vector<16x256xbf16>,
    %c239_i32 = arith.constant 239 : i32
    %78 = tpu.dynamic_rotate %33 by %c239_i32 dim 1 : vector<16x256xf32>, i32 -> vector<16x256xf32>
    %c7 = arith.constant 7 : index
    %c0_34 = arith.constant 0 : index
    %79 = vector.load %arg3[%c7, %c0_34] : memref<8x256xf32, #tpu.memory_space<vmem>>, vector<1x256xf32>
    %80 = vector.broadcast %79 : vector<1x256xf32> to vector<16x256xf32>
    %81 = arith.mulf %78, %80 : vector<16x256xf32>
    %82 = arith.truncf %81 : vector<16x256xf32> to vector<16x256xbf16>
    %c128 = arith.constant 128 : index
    %c0_35 = arith.constant 0 : index
    %83 = vector.load %arg12[%c128, %c0_35] : memref<144x256xbf16, #tpu.memory_space<vmem>>, vector<16x256xbf16>
    tpu.vector_store %arg12[%c128, %c0_35], %82 {strides = array<i32>} : memref<144x256xbf16, #tpu.memory_space<vmem>>, vector<16x256xbf16>,
    %c0_36 = arith.constant 0 : index
    %c0_37 = arith.constant 0 : index
    %c0_38 = arith.constant 0 : index
    %84 = vector.load %arg6[%c0_36, %c0_37, %c0_38] : memref<1x8x144xbf16, #tpu.memory_space<vmem>>, vector<1x8x144xbf16>
    %85 = vector.shape_cast %84 : vector<1x8x144xbf16> to vector<8x144xbf16>
    %c0_39 = arith.constant 0 : index
    %c0_40 = arith.constant 0 : index
    %86 = vector.load %arg12[%c0_39, %c0_40] : memref<144x256xbf16, #tpu.memory_space<vmem>>, vector<144x256xbf16>
    %cst_41 = arith.constant dense<0.000000e+00> : vector<8x256xf32>
    %87 = tpu.matmul %85, %86, %cst_41 {dimension_numbers = #tpu.dot_dimension_numbers<[1], [0], [0], [1], [0, 0, 1, 1], [], []>} : vector<8x144xbf16>, vector<144x256xbf16>, vector<8x256xf32> -> vector<8x256xf32>
    %c0_42 = arith.constant 0 : index
    %c0_43 = arith.constant 0 : index
    %c0_44 = arith.constant 0 : index
    %88 = vector.load %arg7[%c0_42, %c0_43, %c0_44] : memref<1x8x1xf32, #tpu.memory_space<vmem>>, vector<1x8x1xf32>
    %89 = vector.shape_cast %88 : vector<1x8x1xf32> to vector<8x1xf32>
    %90 = vector.broadcast %89 : vector<8x1xf32> to vector<8x256xf32>
    %91 = arith.addf %87, %90 : vector<8x256xf32>
    %c0_45 = arith.constant 0 : index
    %c0_46 = arith.constant 0 : index
    %c0_47 = arith.constant 0 : index
    %92 = vector.load %arg8[%c0_45, %c0_46, %c0_47] : memref<1x8x256xf32, #tpu.memory_space<vmem>>, vector<1x8x256xf32>
    %93 = vector.shape_cast %92 : vector<1x8x256xf32> to vector<8x256xf32>
    %94 = vector.shape_cast %91 : vector<8x256xf32> to vector<1x8x256xf32>
    tpu.vector_store %arg8[%c0_45, %c0_46, %c0_47], %94 {strides = array<i32>} : memref<1x8x256xf32, #tpu.memory_space<vmem>>, vector<1x8x256xf32>,
    %c1_i32_48 = arith.constant 1 : i32
    %95 = arith.addi %arg0, %c1_i32_48 : i32
    %c2_i32 = arith.constant 2 : i32
    %96 = arith.cmpi slt, %95, %c2_i32 : i32
    %97 = arith.extui %96 : i1 to i32
    %c0_i32_49 = arith.constant 0 : i32
    %98 = arith.cmpi ne, %97, %c0_i32_49 : i32
    scf.if %98 {
      %c8_i32 = arith.constant 8 : i32
      %99 = arith.muli %arg0, %c8_i32 : i32
      %c8_i32_50 = arith.constant 8 : i32
      %100 = arith.addi %c8_i32_50, %99 : i32
      %101 = tpu.assume_multiple %100, 8 : i32
      %102 = arith.index_cast %arg1 : i32 to index
      %103 = arith.index_cast %101 : i32 to index
      %c0_51 = arith.constant 0 : index
      %104 = vector.load %arg9[%102, %103, %c0_51] : memref<2x16x256xf32, #tpu.memory_space<vmem>>, vector<1x8x256xf32>
      %105 = vector.shape_cast %104 : vector<1x8x256xf32> to vector<8x256xf32>
      %106 = vector.shape_cast %91 : vector<8x256xf32> to vector<1x8x256xf32>
      tpu.vector_store %arg9[%102, %103, %c0_51], %106 {strides = array<i32>} : memref<2x16x256xf32, #tpu.memory_space<vmem>>, vector<1x8x256xf32>,
      %107 = arith.index_cast %101 : i32 to index
      %c0_52 = arith.constant 0 : index
      %108 = vector.load %arg10[%107, %c0_52] : memref<16x1xf32, #tpu.memory_space<vmem>>, vector<8x1xf32>
      %cst_53 = arith.constant dense<0.000000e+00> : vector<8xf32>
      %109 = vector.multi_reduction <add>, %91, %cst_53 [1] : vector<8x256xf32> to vector<8xf32>
      %110 = vector.shape_cast %109 : vector<8xf32> to vector<8x1xf32>
      %111 = arith.addf %108, %110 : vector<8x1xf32>
      %112 = arith.index_cast %101 : i32 to index
      %c0_54 = arith.constant 0 : index
      %113 = vector.load %arg10[%112, %c0_54] : memref<16x1xf32, #tpu.memory_space<vmem>>, vector<8x1xf32>
      tpu.vector_store %arg10[%112, %c0_54], %111 {strides = array<i32>} : memref<16x1xf32, #tpu.memory_space<vmem>>, vector<8x1xf32>,
      %114 = arith.index_cast %101 : i32 to index
      %c0_55 = arith.constant 0 : index
      %115 = vector.load %arg11[%114, %c0_55] : memref<16x1xf32, #tpu.memory_space<vmem>>, vector<8x1xf32>
      %116 = arith.mulf %91, %91 : vector<8x256xf32>
      %cst_56 = arith.constant dense<0.000000e+00> : vector<8xf32>
      %117 = vector.multi_reduction <add>, %116, %cst_56 [1] : vector<8x256xf32> to vector<8xf32>
      %118 = vector.shape_cast %117 : vector<8xf32> to vector<8x1xf32>
      %119 = arith.addf %115, %118 : vector<8x1xf32>
      %120 = arith.index_cast %101 : i32 to index
      %c0_57 = arith.constant 0 : index
      %121 = vector.load %arg11[%120, %c0_57] : memref<16x1xf32, #tpu.memory_space<vmem>>, vector<8x1xf32>
      tpu.vector_store %arg11[%120, %c0_57], %119 {strides = array<i32>} : memref<16x1xf32, #tpu.memory_space<vmem>>, vector<8x1xf32>,
    } else {
    }
    return
  }
  func.func @transform_0(%arg0: i32, %arg1: i32) -> (i32, i32, i32) {
    %c0_i32 = arith.constant 0 : i32
    %c0_i32_0 = arith.constant 0 : i32
    %c0_i32_1 = arith.constant 0 : i32
    %c0_i32_2 = arith.constant 0 : i32
    return %c0_i32, %c0_i32_0, %c0_i32_1 : i32, i32, i32
  }
  func.func @transform_1(%arg0: i32, %arg1: i32) -> (i32, i32) {
    %c0_i32 = arith.constant 0 : i32
    %c0_i32_0 = arith.constant 0 : i32
    %c0_i32_1 = arith.constant 0 : i32
    return %c0_i32, %c0_i32_0 : i32, i32
  }
  func.func @transform_2(%arg0: i32, %arg1: i32) -> (i32, i32, i32) {
    %c0_i32 = arith.constant 0 : i32
    %c0_i32_0 = arith.constant 0 : i32
    %c0_i32_1 = arith.constant 0 : i32
    return %arg0, %c0_i32, %c0_i32_0 : i32, i32, i32
  }
  func.func @transform_3(%arg0: i32, %arg1: i32) -> (i32, i32, i32) {
    %c0_i32 = arith.constant 0 : i32
    %c0_i32_0 = arith.constant 0 : i32
    %c0_i32_1 = arith.constant 0 : i32
    return %arg0, %c0_i32, %c0_i32_0 : i32, i32, i32
  }
  func.func @transform_4(%arg0: i32, %arg1: i32) -> (i32, i32, i32) {
    %c0_i32 = arith.constant 0 : i32
    %c0_i32_0 = arith.constant 0 : i32
    %c0_i32_1 = arith.constant 0 : i32
    return %arg0, %c0_i32, %c0_i32_0 : i32, i32, i32
  }
  func.func @transform_5(%arg0: i32, %arg1: i32) -> (i32, i32, i32) {
    %c0_i32 = arith.constant 0 : i32
    %c0_i32_0 = arith.constant 0 : i32
    %c0_i32_1 = arith.constant 0 : i32
    return %arg0, %c0_i32, %c0_i32_0 : i32, i32, i32
  }
  func.func @transform_6(%arg0: i32, %arg1: i32) -> (i32, i32, i32) {
    %c0_i32 = arith.constant 0 : i32
    %c0_i32_0 = arith.constant 0 : i32
    return %arg1, %arg0, %c0_i32 : i32, i32, i32
  }
}

</mosaic_0001>

<bundles_post_ra>
// kernel: dense_block_forward.1
= control target key start
LH: loop header
LB: loop body
LE: loop exit
PB: predicated region body
PF: predicated region fallthrough
CT: control target
= control target key end

     0   :  { %s1312_s21 = smov 0   ;;  %s1314_s22 = smov 0   ;;  %s1526_s0 = inlined_call_operand.vmem [shape: f32[2,8,256], index: 0, kind: input, shape index: {}]   ;;  %s1527_s1 = inlined_call_operand.vmem [shape: f32[8,256], index: 1, kind: input, shape index: {}]   ;;  %s1528_s2 = inlined_call_operand.vmem [shape: f32[2,16,1], index: 2, kind: input, shape index: {}]   ;;  %s1529_s3 = inlined_call_operand.vmem [shape: f32[2,16,1], index: 3, kind: input, shape index: {}]   ;;  %s1530_s4 = inlined_call_operand.vmem [shape: bf16[2,8,144], index: 4, kind: input, shape index: {}]   ;;  %s1531_s5 = inlined_call_operand.vmem [shape: f32[2,8,1], index: 5, kind: input, shape index: {}]   ;;  %s1532_s6 = inlined_call_operand.vmem [shape: f32[2,16,256], index: 6, kind: output, shape index: {}]  }
   0x1   :  { %1533 = sst [smem:[#allocation7_spill]] %s1528_s2  ;;  %s1316_s23 = smov 0  }
   0x2   :  { %s1318_s24 = smov 0   ;;  %s1320_s25 = smov 0  }
   0x3 LB: > { %s25_s26 = sadd.s32 1, %s1257_s23  ;;  %s28_s27 = sadd.s32 1, %s1261_s24  ;;  %s1265_s25 = sphi %s1320_s25, %s16_s25   ;;  %s1261_s24 = sphi %s1318_s24, %s1540_s24   ;;  %s1257_s23 = sphi %s1316_s23, %s1539_s23   ;;  %s1253_s22 = sphi %s1314_s22, %s1538_s22   ;;  %s1249_s21 = sphi %s1312_s21, %s1537_s21  }
   0x4   : > { %p26_p0 = scmp.ge.s32.totalorder %s25_s26, 2  ;;  %p1043_p1 = scmp.ge.s32.totalorder %s1265_s25, 1 }
   0x5   : > { %p255_p2 = scmp.lt.s32.totalorder %s1265_s25, 5 }
   0x6   : > { %s1542_s26 = smov (%p26_p0, %s25_s26), 0  ;;  %s1544_s27 = smov (!%p26_p0, %s28_s27), %s1261_s24 }
   0x7   : > { %p256_p3 = pnand %p1043_p1, %p255_p2  ;;  %p30_p4 = scmp.ge.s32.totalorder %s1544_s27, 2 }
   0x8   : > { %p303_p5 = scmp.lt.s32.totalorder (!%p256_p3), %s1253_s22, 1  ;;  %p322_p6 = scmp.lt.s32.totalorder (!%p256_p3), %s1249_s21, 1 }
   0x9   : > { %s1546_s27 = smov (%p30_p4, %s1544_s27), 0  ;;  %259 = sbr.rel (%p256_p3) target bundleno = 797 (0x31d), region = 44 }
   0xa   : > { %1534 = sst [smem:[#allocation6_spill]] %s1546_s27  ;;  %p332_p7 = scmp.eq.s32.totalorder (!%p256_p3), %s1253_s22, 0 }
   0xb   : > { %p333_p8 = scmp.eq.s32.totalorder (!%p256_p3), %s1249_s21, 0  ;;  %s1535_s2 = sld [smem:[#allocation7_spill]] (!%p256_p3) }
   0xd   : > { %p334_p9 = pnand (!%p256_p3), %p333_p8, %p332_p7 }
   0xe   : > { %s304_s28 = scalar_select %p303_p5, %s1253_s22, 1 }
   0xf   : > { %s323_s29 = scalar_select %p322_p6, %s1249_s21, 1 }
  0x10   : > { %s1149_s30 = sshll.u32 %s304_s28, 4  ;;  %s1151_s7 = sshll.u32 %s304_s28, 3 }
  0x11   : > { %s1355_s10 = scalar_lea.vmem %s1535_s2, %s1149_s30  ;;  %s1360_s13 = scalar_lea.vmem %s1529_s3, %s1149_s30 }
  0x12   : > { %s1365_s16 = scalar_lea.vmem %s1530_s4, %s1151_s7  ;;  %s1370_s19 = scalar_lea.vmem %s1531_s5, %s1151_s7 }
  0x13   : > { %s1051_s20 = sshll.u32 %s304_s28, 1  ;;  %s1052_s27 = sshll.u32 %s323_s29, 2 }
  0x14   : > { %s328_s8 = sadd.s32 %s1052_s27, %s1051_s20  ;;  %337 = sbr.rel (%p334_p9) target bundleno = 157 (0x9d), region = 48 }
  0x15   : > { %s1053_s9 = sshll.u32 %s328_s8, 3 }
  0x16   : > { %s1377_s30 = scalar_lea.vmem %s1532_s6, %s1053_s9 }
  0x19   : > { %v351_v0 = vld [vmem:[%s1526_s0] sm:$0xff]  ;;  %v352_v1 = vld [vmem:[%s1526_s0 + $0x8] sm:$0xff]  ;;  %v1267_v3 = vmov 0.0   ;;  %v353_v6 = vld [vmem:[%s1526_s0 + $0x10] sm:$0xff]  ;;  %vm346_vm0 = vcmask 7168  }
  0x1a   : > { %v359_v2 = vadd.f32 %v352_v1, %v351_v0  ;;  %340 = vst [vmem:[#allocation2 + $0x10] sm:$0xff] %v1267_v3  ;;  %v367_v4 = vmul.f32 %v351_v0, %v351_v0  ;;  %v368_v5 = vmul.f32 %v352_v1, %v352_v1  ;;  %v354_v7 = vld [vmem:[%s1526_s0 + $0x18] sm:$0xff]  ;;  %v369_v9 = vmul.f32 %v353_v6, %v353_v6 }
  0x1b   : > { %341 = vst [vmem:[#allocation2 + $0x18] sm:$0xff] %v1267_v3  ;;  %v370_v10 = vmul.f32 %v354_v7, %v354_v7  ;;  %v362_v11 = vadd.f32 %v354_v7, %v353_v6 }
  0x1c   : > { %360 = vadd.xlane.f32.xlu0 %v359_v2  ;;  %344 = vst [vmem:[#allocation2 + $0x30] sm:$0xff] %v1267_v3  ;;  %v371_v8 = vadd.f32 %v368_v5, %v367_v4 }
  0x1d   : > { %345 = vst [vmem:[#allocation2 + $0x38] sm:$0xff] %v1267_v3  ;;  %v374_v12 = vadd.f32 %v370_v10, %v369_v9 }
  0x1e   : > { %355 = vst [vmem:[#allocation2] sm:$0xff] %v351_v0  ;;  %372 = vadd.xlane.f32.xlu1 %v371_v8 }
  0x1f   : > { %356 = vst [vmem:[#allocation2 + $0x8] sm:$0xff] %v352_v1 }
  0x20   : > { %357 = vst [vmem:[#allocation2 + $0x20] sm:$0xff] %v353_v6 }
  0x21   : > { %358 = vst [vmem:[#allocation2 + $0x28] sm:$0xff] %v354_v7 }
  0x22   : > { %347 = vst.msk [vmem:[#allocation3] sm:$0xff] %vm346_vm0, %v1267_v3 }
  0x23   : > { %348 = vst.msk [vmem:[#allocation3 + $0x8] sm:$0xff] %vm346_vm0, %v1267_v3 }
  0x24   : > { %363 = vadd.xlane.f32.xlu0 %v362_v11  ;;  %350 = vst.msk [vmem:[#allocation4 + $0x8] sm:$0xff] %vm346_vm0, %v1267_v3 }
  0x25   : > { %349 = vst.msk [vmem:[#allocation4] sm:$0xff] %vm346_vm0, %v1267_v3 }
  0x26   : > { %375 = vadd.xlane.f32.xlu1 %v374_v12 }
  0x8f   : > { %v361_v13 = vpop.xlane.xlu0 %360 }
  0x91   : > { %v373_v14 = vpop.xlane.xlu1 %372 }
  0x97   : > { %v364_v15 = vpop.xlane.xlu0 %363 }
  0x98   : > { %v365_v16 = vadd.f32 %v364_v15, %v361_v13 }
  0x99   : > { %v376_v17 = vpop.xlane.xlu1 %375 }
  0x9a   : > { %366 = vst.msk [vmem:[#allocation3] sm:$0xff] %vm346_vm0, %v365_v16  ;;  %v377_v18 = vadd.f32 %v376_v17, %v373_v14 }
  0x9c   : > { %378 = vst.msk [vmem:[#allocation4] sm:$0xff] %vm346_vm0, %v377_v18 }
  0x9d PF: > { %v1268_v21 = vmov 0   ;;  %v387_v24 = vld [vmem:[#allocation3 + $0x8] sm:$0xff]  ;;  %v391_v25 = vld [vmem:[#allocation4 + $0x8] sm:$0xff]  ;;  %v400_v46 = vld [vmem:[%s1355_s10] sm:$0xff]  ;;  %s1152_s7 = sshll.u32 %s1249_s21, 5  ;;  %s1271_s20 = smov 127  }
  0x9e   : > { %1221 = vset.pattern.permute.xlu0 %v1268_v21  ;;  %1222 = vset.pattern.permute.xlu1 %v1268_v21  ;;  %v389_v26 = vmul.f32 0.001953125, %v387_v24  ;;  %v393_v27 = vmul.f32 0.001953125, %v391_v25  ;;  %v401_v50 = vld [vmem:[%s1355_s10 + $0x8] sm:$0xff]  ;;  %v426_v53 = vld [vmem:[%s1360_s13] sm:$0xff]  ;;  %s381_s18 = scalar_lea.vmem [#allocation2], %s1152_s7  ;;  %s1269_s10 = smov 112   ;;  %v472_v21 = vlaneseq }
  0x9f   : > { %v427_v58 = vld [vmem:[%s1360_s13 + $0x8] sm:$0xff]  ;;  %v382_v60 = vld [vmem:[%s381_s18] sm:$0xff]  ;;  %v384_v7 = vld [vmem:[%s381_s18 + $0x10] sm:$0xff]  ;;  %s1270_s13 = smov 113   ;;  %s1054_s8 = sshll.u32 %s1249_s21, 2  ;;  %vm814_vm15 = vcmask 130048  }
  0xa0   : > { %v395_v29 = vmul.f32 %v389_v26, %v389_v26  ;;  %v383_v61 = vld [vmem:[%s381_s18 + $0x8] sm:$0xff]  ;;  %v385_v8 = vld [vmem:[%s381_s18 + $0x18] sm:$0xff]  ;;  %s1272_s9 = smov 1   ;;  %s1273_s11 = smov 15   ;;  %v712_v18 = vld [vmem:[%s1370_s19] sm:$0xff] }
  0xa1   : > { %v386_v19 = vld [vmem:[#allocation3] sm:$0xff]  ;;  %s1274_s12 = smov 16   ;;  %s1275_s14 = smov 17  }
  0xa2   : > { %v388_v22 = vmul.f32 0.001953125, %v386_v19  ;;  %v397_v31 = vsub.f32 %v393_v27, %v395_v29  ;;  %s1276_s15 = smov 111   ;;  %v1061_v24 = vld [vmem:[%s1527_s1 + $0x6] ss:$8 sm:$0x3] }
  0xa3   : > { %v390_v20 = vld [vmem:[#allocation4] sm:$0xff]  ;;  %v653_v25 = vperm.slane %v1061_v24, 0 }
  0xa4   : > { %v392_v23 = vmul.f32 0.001953125, %v390_v20  ;;  %v394_v28 = vmul.f32 %v388_v22, %v388_v22  ;;  %v399_v33 = vmax.f32 %v397_v31, 0.0 }
  0xa6   : > { %v396_v30 = vsub.f32 %v392_v23, %v394_v28  ;;  %v403_v35 = vadd.f32 1e-05, %v399_v33  ;;  %v1398_v23 = vand.u32 127, %v472_v21  ;;  %v1060_v33 = vld [vmem:[%s1527_s1 + $0x5] ss:$8 sm:$0x3] }
  0xa8   : > { %v398_v32 = vmax.f32 %v396_v30, 0.0  ;;  %vm420_vm3 = vweird.f32 %v403_v35  ;;  %vm645_vm7 = vcmp.lt.s32.totalorder %v1398_v23, 112  ;;  %vm617_vm8 = vcmp.lt.s32.totalorder %v1398_v23, 113 }
  0xa9   : > { %vm589_vm9 = vcmp.lt.s32.totalorder %v1398_v23, 127  ;;  %vm557_vm10 = vcmp.lt.s32.totalorder %v1398_v23, 1  ;;  %vm529_vm11 = vcmp.lt.s32.totalorder %v1398_v23, 15  ;;  %vm501_vm12 = vcmp.lt.s32.totalorder %v1398_v23, 16 }
  0xaa   : > { %v402_v34 = vadd.f32 1e-05, %v398_v32  ;;  %vm474_vm13 = vcmp.lt.s32.totalorder %v1398_v23, 17  ;;  %vm673_vm14 = vcmp.lt.s32.totalorder %v1398_v23, 111 }
  0xac   : > { %1223 = vrsqrt.f32 %v402_v34  ;;  %vm410_vm1 = vweird.f32 %v402_v34 }
  0xad   : > { %1225 = vrsqrt.f32 %v403_v35 }
  0xb2   : > { %v1224_v36 = vpop.eup %1223 }
  0xb3   : > { %v1226_v37 = vpop.eup %1225  ;;  %v405_v38 = vmul.f32 %v1224_v36, %v402_v34  ;;  %vm411_vm2 = vweird.f32 %v1224_v36 }
  0xb4   : > { %v415_v39 = vmul.f32 %v1226_v37, %v403_v35  ;;  %vm421_vm4 = vweird.f32 %v1226_v37  ;;  %vm412_vm5 = vmor %vm410_vm1, %vm411_vm2  ;;  %v625_v35 = vperm.slane %v1060_v33, 0 }
  0xb5   : > { %v406_v40 = vmul.f32 %v1224_v36, %v405_v38  ;;  %vm422_vm6 = vmor %vm420_vm3, %vm421_vm4 }
  0xb6   : > { %v416_v41 = vmul.f32 %v1226_v37, %v415_v39 }
  0xb7   : > { %v407_v42 = vmul.f32 0.5, %v406_v40 }
  0xb8   : > { %v417_v43 = vmul.f32 0.5, %v416_v41 }
  0xb9   : > { %v408_v44 = vsub.f32 1.5, %v407_v42 }
  0xba   : > { %v418_v45 = vsub.f32 1.5, %v417_v43 }
  0xbb   : > { %v409_v47 = vmul.f32 %v1224_v36, %v408_v44 }
  0xbc   : > { %v419_v48 = vmul.f32 %v1226_v37, %v418_v45 }
  0xbd   : > { %v413_v49 = vsel %vm412_vm5, %v1224_v36, %v409_v47  ;;  %v626_v36 = vperm.slane %v1060_v33, 1  ;;  %v1057_v33 = vld [vmem:[%s1527_s1 + $0x2] ss:$8 sm:$0x3] }
  0xbe   : > { %v424_v51 = vmul.f32 %v413_v49, %v400_v46  ;;  %v423_v52 = vsel %vm422_vm6, %v1226_v37, %v419_v48  ;;  %v1059_v48 = vld [vmem:[%s1527_s1 + $0x4] ss:$8 sm:$0x3] }
  0xbf   : > { %v425_v55 = vmul.f32 %v423_v52, %v401_v50  ;;  %v598_v52 = vperm.slane %v1059_v48, 1 }
  0xc0   : > { %434 = vperm.xlu0 %1221, %v424_v51   ;;  %v428_v54 = vmul.f32 %v424_v51, %v388_v22  ;;  %v597_v51 = vperm.slane %v1059_v48, 0 }
  0xc1   : > { %v429_v57 = vmul.f32 %v425_v55, %v389_v26  ;;  %v654_v26 = vperm.slane %v1061_v24, 1 }
  0xc2   : > { %v430_v56 = vsub.f32 %v426_v53, %v428_v54 }
  0xc3   : > { %v431_v59 = vsub.f32 %v427_v58, %v429_v57 }
  0xc4   : > { %448 = vperm.xlu1 %1222, %v430_v56  }
  0xc8   : > { %439 = vperm.xlu0 %1221, %v425_v55  }
  0xcc   : > { %453 = vperm.xlu1 %1222, %v431_v59  }
 0x132   : > { %v435_v62 = vpop.permute.xlu0 %434 }
 0x133   : > { %v442_v63 = vmul.f32 %v435_v62, %v382_v60  ;;  %v443_v0 = vmul.f32 %v435_v62, %v383_v61 }
 0x136   : > { %v449_v1 = vpop.permute.xlu1 %448 }
 0x137   : > { %v456_v2 = vadd.f32 %v449_v1, %v442_v63  ;;  %v457_v3 = vadd.f32 %v449_v1, %v443_v0 }
 0x139   : > { %v460_v4 = vmax.f32 %v456_v2, 0.0  ;;  %v461_v5 = vmax.f32 %v457_v3, 0.0 }
 0x13a   : > { %v440_v6 = vpop.permute.xlu0 %439 }
 0x13b   : > { %641 = vrot.lane.b32.xlu0 %v461_v5, %s1269_s10  ;;  %637 = vrot.lane.b32.xlu2 %v460_v4, %s1269_s10  ;;  %v577_v9 = vpack.c.bf16 %v461_v5, %v460_v4  ;;  %v444_v10 = vmul.f32 %v440_v6, %v384_v7  ;;  %v445_v11 = vmul.f32 %v440_v6, %v385_v8 }
 0x13d   : > { %579 = vst [vmem:[#allocation5 + $0x40] sm:$0xff] %v577_v9 }
 0x13e   : > { %v454_v12 = vpop.permute.xlu1 %453 }
 0x13f   : > { %v458_v13 = vadd.f32 %v454_v12, %v444_v10  ;;  %v459_v14 = vadd.f32 %v454_v12, %v445_v11 }
 0x141   : > { %v462_v15 = vmax.f32 %v458_v13, 0.0  ;;  %v463_v16 = vmax.f32 %v459_v14, 0.0 }
 0x143   : > { %643 = vrot.lane.b32.xlu1 %v463_v16, %s1269_s10  ;;  %611 = vrot.lane.b32.xlu0 %v462_v15, %s1270_s13  ;;  %v578_v17 = vpack.c.bf16 %v463_v16, %v462_v15 }
 0x144   : > { %639 = vrot.lane.b32.xlu2 %v462_v15, %s1269_s10 }
 0x145   : > { %580 = vst [vmem:[#allocation5 + $0x48] sm:$0xff] %v578_v17 }
 0x14b   : > { %613 = vrot.lane.b32.xlu1 %v461_v5, %s1270_s13  ;;  %581 = vrot.lane.b32.xlu0 %v460_v4, %s1271_s20 }
 0x14c   : > { %609 = vrot.lane.b32.xlu2 %v460_v4, %s1270_s13 }
 0x153   : > { %583 = vrot.lane.b32.xlu1 %v462_v15, %s1271_s20  ;;  %587 = vrot.lane.b32.xlu0 %v463_v16, %s1271_s20 }
 0x154   : > { %615 = vrot.lane.b32.xlu2 %v463_v16, %s1270_s13 }
 0x15b   : > { %549 = vrot.lane.b32.xlu1 %v460_v4, %s1272_s9  ;;  %553 = vrot.lane.b32.xlu0 %v461_v5, %s1272_s9 }
 0x15c   : > { %585 = vrot.lane.b32.xlu2 %v461_v5, %s1271_s20 }
 0x163   : > { %555 = vrot.lane.b32.xlu1 %v463_v16, %s1272_s9  ;;  %523 = vrot.lane.b32.xlu0 %v462_v15, %s1273_s11 }
 0x164   : > { %551 = vrot.lane.b32.xlu2 %v462_v15, %s1272_s9 }
 0x16b   : > { %525 = vrot.lane.b32.xlu1 %v461_v5, %s1273_s11  ;;  %493 = vrot.lane.b32.xlu0 %v460_v4, %s1274_s12 }
 0x16c   : > { %521 = vrot.lane.b32.xlu2 %v460_v4, %s1273_s11 }
 0x173   : > { %495 = vrot.lane.b32.xlu1 %v462_v15, %s1274_s12  ;;  %499 = vrot.lane.b32.xlu0 %v463_v16, %s1274_s12 }
 0x174   : > { %527 = vrot.lane.b32.xlu2 %v463_v16, %s1273_s11 }
 0x17b   : > { %464 = vrot.lane.b32.xlu1 %v460_v4, %s1275_s14  ;;  %468 = vrot.lane.b32.xlu0 %v461_v5, %s1275_s14 }
 0x17c   : > { %497 = vrot.lane.b32.xlu2 %v461_v5, %s1274_s12 }
 0x183   : > { %470 = vrot.lane.b32.xlu1 %v463_v16, %s1275_s14  ;;  %667 = vrot.lane.b32.xlu0 %v462_v15, %s1276_s15 }
 0x184   : > { %466 = vrot.lane.b32.xlu2 %v462_v15, %s1275_s14  ;;  %v1058_v15 = vld [vmem:[%s1527_s1 + $0x3] ss:$8 sm:$0x3] }
 0x185   : > { %v565_v21 = vperm.slane %v1058_v15, 0 }
 0x18b   : > { %669 = vrot.lane.b32.xlu1 %v461_v5, %s1276_s15  ;;  %715 = vperm.xlu0 %1221, %v712_v18  }
 0x18c   : > { %665 = vrot.lane.b32.xlu2 %v460_v4, %s1276_s15 }
 0x194   : > { %671 = vrot.lane.b32.xlu2 %v463_v16, %s1276_s15 }
 0x195   : > { %v638_v19 = vpop.permute.xlu2 %637 }
 0x19e   : > { %v640_v20 = vpop.permute.xlu2 %639 }
 0x1a6   : > { %v610_v22 = vpop.permute.xlu2 %609 }
 0x1ad   : > { %v642_v27 = vpop.permute.xlu0 %641 }
 0x1ae   : > { %v646_v28 = vsel %vm645_vm7, %v638_v19, %v642_v27  ;;  %v648_v29 = vsel %vm645_vm7, %v642_v27, %v638_v19  ;;  %v616_v30 = vpop.permute.xlu2 %615 }
 0x1af   : > { %v657_v31 = vmul.f32 %v653_v25, %v646_v28  ;;  %v658_v32 = vmul.f32 %v654_v26, %v648_v29 }
 0x1b1   : > { %v661_v34 = vpack.c.bf16 %v658_v32, %v657_v31 }
 0x1b3   : > { %663 = vst [vmem:[#allocation5 + $0x70] sm:$0xff] %v661_v34  ;;  %v1162_v34 = vld [vmem:[#allocation5 + $0x44] sm:$0xf0] }
 0x1b5   : > { %v644_v37 = vpop.permute.xlu1 %643  ;;  %v612_v38 = vpop.permute.xlu0 %611 }
 0x1b6   : > { %v647_v39 = vsel %vm645_vm7, %v640_v20, %v644_v37  ;;  %v649_v40 = vsel %vm645_vm7, %v644_v37, %v640_v20  ;;  %v619_v41 = vsel %vm617_vm8, %v612_v38, %v616_v30  ;;  %v621_v42 = vsel %vm617_vm8, %v616_v30, %v612_v38  ;;  %v586_v43 = vpop.permute.xlu2 %585  ;;  %v1099_v37 = vld [vmem:[#allocation5 + $0x48] sm:$0xf0] }
 0x1b7   : > { %v659_v44 = vmul.f32 %v653_v25, %v647_v39  ;;  %v660_v45 = vmul.f32 %v654_v26, %v649_v40  ;;  %v631_v46 = vmul.f32 %v625_v35, %v619_v41  ;;  %v632_v47 = vmul.f32 %v626_v36, %v621_v42 }
 0x1b8   : > { %v537_v41 = vperm.slane %v1057_v33, 0  ;;  %v538_v42 = vperm.slane %v1057_v33, 1 }
 0x1b9   : > { %v662_v49 = vpack.c.bf16 %v660_v45, %v659_v44  ;;  %v634_v50 = vpack.c.bf16 %v632_v47, %v631_v46  ;;  %v1097_v45 = vld [vmem:[#allocation5 + $0x40] sm:$0xf]  ;;  %v1161_v46 = vld [vmem:[#allocation5 + $0x44] sm:$0xf] }
 0x1ba   : > { %v1121_v2 = vld [vmem:[#allocation5 + $0x70] sm:$0xf]  ;;  %v1167_v4 = vld [vmem:[#allocation5 + $0x74] sm:$0xf] }
 0x1bb   : > { %664 = vst [vmem:[#allocation5 + $0x78] sm:$0xff] %v662_v49  ;;  %v1098_v49 = vor.u32 %v1162_v34, %v1097_v45 }
 0x1bc   : > { %636 = vst [vmem:[#allocation5 + $0x68] sm:$0xff] %v634_v50  ;;  %v1102_v50 = vor.u32 %v1161_v46, %v1099_v37 }
 0x1bd   : > { %v614_v53 = vpop.permute.xlu1 %613  ;;  %v582_v54 = vpop.permute.xlu0 %581 }
 0x1be   : > { %v618_v55 = vsel %vm617_vm8, %v610_v22, %v614_v53  ;;  %v620_v56 = vsel %vm617_vm8, %v614_v53, %v610_v22  ;;  %v590_v57 = vsel %vm589_vm9, %v582_v54, %v586_v43  ;;  %v592_v58 = vsel %vm589_vm9, %v586_v43, %v582_v54  ;;  %v1432_v59 = vpop.permute.xlu2 %551 }
 0x1bf   : > { %v629_v60 = vmul.f32 %v625_v35, %v618_v55  ;;  %v630_v61 = vmul.f32 %v626_v36, %v620_v56  ;;  %v601_v62 = vmul.f32 %v597_v51, %v590_v57  ;;  %v602_v63 = vmul.f32 %v598_v52, %v592_v58 }
 0x1c0   : > { %v566_v22 = vperm.slane %v1058_v15, 1 }
 0x1c1   : > { %v633_v0 = vpack.c.bf16 %v630_v61, %v629_v60  ;;  %v605_v1 = vpack.c.bf16 %v602_v63, %v601_v62  ;;  %v1056_v61 = vld [vmem:[%s1527_s1 + $0x1] ss:$8 sm:$0x3] }
 0x1c2   : > { %v1168_v3 = vld [vmem:[#allocation5 + $0x74] sm:$0xf0]  ;;  %v1123_v5 = vld [vmem:[#allocation5 + $0x78] sm:$0xf0] }
 0x1c3   : > { %635 = vst [vmem:[#allocation5 + $0x60] sm:$0xff] %v633_v0  ;;  %v1122_v6 = vor.u32 %v1168_v3, %v1121_v2  ;;  %v1126_v7 = vor.u32 %v1167_v4, %v1123_v5  ;;  %v1166_v17 = vld [vmem:[#allocation5 + $0x64] sm:$0xf0]  ;;  %v1115_v20 = vld [vmem:[#allocation5 + $0x68] sm:$0xf0]  ;;  %v510_v0 = vperm.slane %v1056_v61, 1 }
 0x1c4   : > { %607 = vst [vmem:[#allocation5 + $0x50] sm:$0xff] %v605_v1 }
 0x1c5   : > { %v584_v8 = vpop.permute.xlu1 %583  ;;  %v588_v9 = vpop.permute.xlu0 %587  ;;  %818 = vmatpush.bf16.msra.mxu0 %v1122_v6  ;;  %844 = vmatpush.bf16.msra.mxu2 %v1126_v7 }
 0x1c6   : > { %v591_v10 = vsel %vm589_vm9, %v584_v8, %v588_v9  ;;  %v593_v11 = vsel %vm589_vm9, %v588_v9, %v584_v8  ;;  %v1438_v12 = vpop.permute.xlu2 %521 }
 0x1c7   : > { %v603_v13 = vmul.f32 %v597_v51, %v591_v10  ;;  %v604_v14 = vmul.f32 %v598_v52, %v593_v11 }
 0x1c9   : > { %v606_v16 = vpack.c.bf16 %v604_v14, %v603_v13 }
 0x1ca   : > { %v1113_v18 = vld [vmem:[#allocation5 + $0x60] sm:$0xf]  ;;  %v1165_v19 = vld [vmem:[#allocation5 + $0x64] sm:$0xf] }
 0x1cb   : > { %608 = vst [vmem:[#allocation5 + $0x58] sm:$0xff] %v606_v16  ;;  %v1114_v24 = vor.u32 %v1166_v17, %v1113_v18  ;;  %v1118_v25 = vor.u32 %v1165_v19, %v1115_v20  ;;  %v1105_v36 = vld [vmem:[#allocation5 + $0x50] sm:$0xf]  ;;  %v1163_v39 = vld [vmem:[#allocation5 + $0x54] sm:$0xf] }
 0x1cd   : > { %v550_v26 = vpop.permute.xlu1 %549  ;;  %v554_v27 = vpop.permute.xlu0 %553  ;;  %819 = vmatpush.bf16.msra.mxu0 %v1114_v24  ;;  %845 = vmatpush.bf16.msra.mxu2 %v1118_v25 }
 0x1ce   : > { %v558_v28 = vsel %vm557_vm10, %v550_v26, %v554_v27  ;;  %v560_v29 = vsel %vm557_vm10, %v554_v27, %v550_v26  ;;  %v528_v30 = vpop.permute.xlu2 %527  ;;  %v479_v27 = vld [vmem:[%s1527_s1] ss:$8 sm:$0x3] }
 0x1cf   : > { %v569_v31 = vmul.f32 %v565_v21, %v560_v29  ;;  %v570_v32 = vmul.f32 %v566_v22, %v558_v28  ;;  %v481_v34 = vperm.slane %v479_v27, 0 }
 0x1d1   : > { %v573_v35 = vpack.c.bf16 %v570_v32, %v569_v31 }
 0x1d2   : > { %v1164_v38 = vld [vmem:[#allocation5 + $0x54] sm:$0xf0]  ;;  %v1107_v40 = vld [vmem:[#allocation5 + $0x58] sm:$0xf0] }
 0x1d3   : > { %575 = vst [vmem:[#allocation5 + $0x30] sm:$0xff] %v573_v35  ;;  %v1106_v43 = vor.u32 %v1164_v38, %v1105_v36  ;;  %v1110_v44 = vor.u32 %v1163_v39, %v1107_v40  ;;  %v482_v35 = vperm.slane %v479_v27, 1 }
 0x1d5   : > { %v556_v47 = vpop.permute.xlu1 %555  ;;  %v524_v48 = vpop.permute.xlu0 %523  ;;  %820 = vmatpush.bf16.msra.mxu0 %v1106_v43  ;;  %846 = vmatpush.bf16.msra.mxu2 %v1110_v44  ;;  %v1062_v44 = vld [vmem:[%s1527_s1 + $0x7] ss:$8 sm:$0x3] }
 0x1d6   : > { %v559_v51 = vsel %vm557_vm10, %v1432_v59, %v556_v47  ;;  %v561_v52 = vsel %vm557_vm10, %v556_v47, %v1432_v59  ;;  %v531_v53 = vsel %vm529_vm11, %v524_v48, %v528_v30  ;;  %v533_v54 = vsel %vm529_vm11, %v528_v30, %v524_v48  ;;  %v498_v55 = vpop.permute.xlu2 %497 }
 0x1d7   : > { %v571_v56 = vmul.f32 %v565_v21, %v561_v52  ;;  %v572_v57 = vmul.f32 %v566_v22, %v559_v51  ;;  %v543_v58 = vmul.f32 %v537_v41, %v533_v54  ;;  %v544_v60 = vmul.f32 %v538_v42, %v531_v53 }
 0x1d8   : > { %v509_v59 = vperm.slane %v1056_v61, 0  ;;  %v682_v51 = vperm.slane %v1062_v44, 1 }
 0x1d9   : > { %v574_v62 = vpack.c.bf16 %v572_v57, %v571_v56  ;;  %v546_v63 = vpack.c.bf16 %v544_v60, %v543_v58  ;;  %821 = vmatpush.bf16.msra.mxu0 %v1098_v49  ;;  %847 = vmatpush.bf16.msra.mxu2 %v1102_v50  ;;  %v681_v50 = vperm.slane %v1062_v44, 0 }
 0x1da   : > { %v1089_v15 = vld [vmem:[#allocation5 + $0x30] sm:$0xf]  ;;  %v1159_v17 = vld [vmem:[#allocation5 + $0x34] sm:$0xf] }
 0x1db   : > { %576 = vst [vmem:[#allocation5 + $0x38] sm:$0xff] %v574_v62 }
 0x1dc   : > { %548 = vst [vmem:[#allocation5 + $0x28] sm:$0xff] %v546_v63 }
 0x1dd   : > { %v526_v1 = vpop.permute.xlu1 %525  ;;  %v494_v2 = vpop.permute.xlu0 %493 }
 0x1de   : > { %v530_v3 = vsel %vm529_vm11, %v1438_v12, %v526_v1  ;;  %v532_v4 = vsel %vm529_vm11, %v526_v1, %v1438_v12  ;;  %v502_v5 = vsel %vm501_vm12, %v494_v2, %v498_v55  ;;  %v504_v6 = vsel %vm501_vm12, %v498_v55, %v494_v2  ;;  %v467_v11 = vpop.permute.xlu2 %466 }
 0x1df   : > { %v541_v7 = vmul.f32 %v537_v41, %v532_v4  ;;  %v542_v8 = vmul.f32 %v538_v42, %v530_v3  ;;  %v513_v9 = vmul.f32 %v509_v59, %v504_v6  ;;  %v514_v10 = vmul.f32 %v510_v0, %v502_v5  ;;  %v693_v4 = vld [vmem:[%s1365_s16] sm:$0xff]  ;;  %s872_s16 = sadd.s32 1, %s1253_s22 }
 0x1e0   : > { %p1137_p10 = scmp.ge.s32.totalorder %s872_s16, 2 }
 0x1e1   : > { %v545_v13 = vpack.c.bf16 %v542_v8, %v541_v7  ;;  %v517_v14 = vpack.c.bf16 %v514_v10, %v513_v9  ;;  %v719_v9 = vunpack.c.l.b16 %v693_v4  ;;  %s1138_s17 = sshll.u32 (!%p1137_p10), %s1253_s22, 3 }
 0x1e2   : > { %v1160_v16 = vld [vmem:[#allocation5 + $0x34] sm:$0xf0]  ;;  %v1091_v18 = vld [vmem:[#allocation5 + $0x38] sm:$0xf0]  ;;  %s878_s27 = sadd.s32 (!%p1137_p10), 8, %s1138_s17  ;;  %s978_s22 = scalar_lea.vmem (!%p1137_p10), [#allocation4], %s1138_s17 }
 0x1e3   : > { %547 = vst [vmem:[#allocation5 + $0x20] sm:$0xff] %v545_v13  ;;  %v1090_v19 = vor.u32 %v1160_v16, %v1089_v15  ;;  %v1094_v12 = vor.u32 %v1159_v17, %v1091_v18  ;;  %v1158_v29 = vld [vmem:[#allocation5 + $0x24] sm:$0xf0]  ;;  %v1083_v33 = vld [vmem:[#allocation5 + $0x28] sm:$0xf0]  ;;  %v721_v18 = vpack.c.b16 %v719_v9, %v719_v9  ;;  %s879_s19 = sshra.s32 (!%p1137_p10), %s878_s27, 3 }
 0x1e4   : > { %519 = vst [vmem:[#allocation5 + $0x10] sm:$0xff] %v517_v14  ;;  %s1139_s28 = sshll.u32 (!%p1137_p10), %s879_s19, 1 }
 0x1e5   : > { %v496_v20 = vpop.permute.xlu1 %495  ;;  %v500_v21 = vpop.permute.xlu0 %499  ;;  %822 = vmatpush.bf16.msra.mxu0 %v1090_v19  ;;  %848 = vmatpush.bf16.msra.mxu2 %v1094_v12  ;;  %v720_v19 = vunpack.c.h.b16 %v693_v4  ;;  %s882_s2 = sadd.s32 (!%p1137_p10), %s1139_s28, %s1054_s8 }
 0x1e6   : > { %v503_v22 = vsel %vm501_vm12, %v496_v20, %v500_v21  ;;  %v505_v24 = vsel %vm501_vm12, %v500_v21, %v496_v20  ;;  %v666_v30 = vpop.permute.xlu2 %665  ;;  %s1140_s29 = sshll.u32 (!%p1137_p10), %s882_s2, 3 }
 0x1e7   : > { %v515_v25 = vmul.f32 %v509_v59, %v505_v24  ;;  %v516_v26 = vmul.f32 %v510_v0, %v503_v22  ;;  %s884_s7 = scalar_lea.vmem (!%p1137_p10), [#allocation2], %s1140_s29 }
 0x1e9   : > { %v518_v28 = vpack.c.bf16 %v516_v26, %v515_v25  ;;  %v722_v25 = vpack.c.b16 %v720_v19, %v720_v19 }
 0x1ea   : > { %v1081_v31 = vld [vmem:[#allocation5 + $0x20] sm:$0xf]  ;;  %v1157_v32 = vld [vmem:[#allocation5 + $0x24] sm:$0xf] }
 0x1eb   : > { %520 = vst [vmem:[#allocation5 + $0x18] sm:$0xff] %v518_v28  ;;  %v1082_v36 = vor.u32 %v1158_v29, %v1081_v31  ;;  %v1086_v37 = vor.u32 %v1157_v32, %v1083_v33  ;;  %v1073_v46 = vld [vmem:[#allocation5 + $0x10] sm:$0xf]  ;;  %v1155_v48 = vld [vmem:[#allocation5 + $0x14] sm:$0xf] }
 0x1ed   : > { %v465_v38 = vpop.permute.xlu1 %464  ;;  %v469_v39 = vpop.permute.xlu0 %468  ;;  %823 = vmatpush.bf16.msra.mxu0 %v1082_v36  ;;  %849 = vmatpush.bf16.msra.mxu2 %v1086_v37 }
 0x1ee   : > { %v475_v40 = vsel %vm474_vm13, %v465_v38, %v469_v39  ;;  %v477_v41 = vsel %vm474_vm13, %v469_v39, %v465_v38  ;;  %v672_v54 = vpop.permute.xlu2 %671 }
 0x1ef   : > { %v485_v42 = vmul.f32 %v481_v34, %v477_v41  ;;  %v486_v43 = vmul.f32 %v482_v35, %v475_v40 }
 0x1f1   : > { %v489_v45 = vpack.c.bf16 %v486_v43, %v485_v42 }
 0x1f2   : > { %v1156_v47 = vld [vmem:[#allocation5 + $0x14] sm:$0xf0]  ;;  %v1075_v49 = vld [vmem:[#allocation5 + $0x18] sm:$0xf0] }
 0x1f3   : > { %491 = vst [vmem:[#allocation5] sm:$0xff] %v489_v45  ;;  %v1074_v52 = vor.u32 %v1156_v47, %v1073_v46  ;;  %v1078_v53 = vor.u32 %v1155_v48, %v1075_v49 }
 0x1f5   : > { %v471_v55 = vpop.permute.xlu1 %470  ;;  %v668_v56 = vpop.permute.xlu0 %667  ;;  %824 = vmatpush.bf16.msra.mxu0 %v1074_v52  ;;  %850 = vmatpush.bf16.msra.mxu2 %v1078_v53 }
 0x1f6   : > { %v476_v57 = vsel %vm474_vm13, %v467_v11, %v471_v55  ;;  %v478_v58 = vsel %vm474_vm13, %v471_v55, %v467_v11  ;;  %v675_v60 = vsel %vm673_vm14, %v668_v56, %v672_v54  ;;  %v677_v61 = vsel %vm673_vm14, %v672_v54, %v668_v56 }
 0x1f7   : > { %v487_v62 = vmul.f32 %v481_v34, %v478_v58  ;;  %v488_v63 = vmul.f32 %v482_v35, %v476_v57  ;;  %v687_v59 = vmul.f32 %v681_v50, %v675_v60  ;;  %v688_v0 = vmul.f32 %v682_v51, %v677_v61 }
 0x1f9   : > { %v490_v1 = vpack.c.bf16 %v488_v63, %v487_v62  ;;  %v690_v2 = vpack.c.bf16 %v688_v0, %v687_v59 }
 0x1fa   : > { %v1065_v11 = vld [vmem:[#allocation5] sm:$0xf]  ;;  %v1153_v14 = vld [vmem:[#allocation5 + $0x4] sm:$0xf] }
 0x1fb   : > { %492 = vst [vmem:[#allocation5 + $0x8] sm:$0xff] %v490_v1 }
 0x1fc   : > { %692 = vst [vmem:[#allocation5 + $0x88] sm:$0xff] %v690_v2 }
 0x1fd   : > { %v670_v3 = vpop.permute.xlu1 %669  ;;  %v716_v27 = vpop.permute.xlu0 %715 }
 0x1fe   : > { %v674_v5 = vsel %vm673_vm14, %v666_v30, %v670_v3  ;;  %v676_v6 = vsel %vm673_vm14, %v670_v3, %v666_v30 }
 0x1ff   : > { %v685_v7 = vmul.f32 %v681_v50, %v674_v5  ;;  %v686_v8 = vmul.f32 %v682_v51, %v676_v6 }
 0x201   : > { %v689_v10 = vpack.c.bf16 %v686_v8, %v685_v7 }
 0x202   : > { %v1154_v13 = vld [vmem:[#allocation5 + $0x4] sm:$0xf0]  ;;  %v1067_v15 = vld [vmem:[#allocation5 + $0x8] sm:$0xf0] }
 0x203   : > { %691 = vst [vmem:[#allocation5 + $0x80] sm:$0xff] %v689_v10  ;;  %v1066_v16 = vor.u32 %v1154_v13, %v1065_v11  ;;  %v1070_v17 = vor.u32 %v1153_v14, %v1067_v15  ;;  %v1170_v23 = vld [vmem:[#allocation5 + $0x84] sm:$0xf0]  ;;  %v1131_v21 = vld [vmem:[#allocation5 + $0x88] sm:$0xf0] }
 0x205   : > { %825 = vmatpush.bf16.msra.mxu0 %v1066_v16  ;;  %851 = vmatpush.bf16.msra.mxu2 %v1070_v17 }
 0x208   : > { %826 = vmatmul.bf16.vlgmr.msra.gmra.mxu0 %v721_v18  ;;  %852 = vmatmul.bf16.vlgmr.msra.gmra.mxu2 %v721_v18 }
 0x20a   : > { %v1129_v12 = vld [vmem:[#allocation5 + $0x80] sm:$0xf]  ;;  %v1169_v20 = vld [vmem:[#allocation5 + $0x84] sm:$0xf] }
 0x20b   : > { %v1130_v22 = vor.u32 %v1170_v23, %v1129_v12  ;;  %v1134_v24 = vor.u32 %v1169_v20, %v1131_v21 }
 0x20d   : > { %838 = vmatpush.bf16.msra.mxu1 %v1130_v22  ;;  %864 = vmatpush.bf16.msra.mxu3 %v1134_v24 }
 0x210   : > { %1135 = vmatmul.msk.bf16.vlgmr.msra.gmra.mxu1 %vm814_vm15, %v722_v25  ;;  %1136 = vmatmul.msk.bf16.vlgmr.msra.gmra.mxu3 %vm814_vm15, %v722_v25 }
 0x285   : > { %v827_v26 = vpop.f32.mrf.mxu0 }
 0x286   : > { %v828_v29 = vadd.f32 %v827_v26, %v716_v27 }
 0x28b   : > { %v853_v28 = vpop.f32.mrf.mxu2 }
 0x28c   : > { %v854_v33 = vadd.f32 %v853_v28, %v716_v27 }
 0x28d   : > { %v840_v30 = vpop.f32.mrf.mxu1  ;;  %v829_v31 = vpop.f32.mrf.mxu0 }
 0x28e   : > { %v841_v32 = vadd.f32 %v840_v30, %v828_v29 }
 0x290   : > { %870 = vst [vmem:[%s1377_s30] sm:$0xff] %v841_v32 }
 0x293   : > { %v855_v34 = vpop.f32.mrf.mxu2  ;;  %v866_v35 = vpop.f32.mrf.mxu3 }
 0x294   : > { %v867_v36 = vadd.f32 %v866_v35, %v854_v33 }
 0x295   : > { %v842_v37 = vpop.f32.mrf.mxu1 }
 0x296   : > { %871 = vst [vmem:[%s1377_s30 + $0x8] sm:$0xff] %v867_v36  ;;  %s975_s30 = scalar_lea.vmem (!%p1137_p10), [#allocation3], %s1138_s17 }
 0x297   : > { %876 = sbr.rel (%p1137_p10) target bundleno = 797 (0x31d), region = 52 }
 0x29b   : > { %v868_v38 = vpop.f32.mrf.mxu3 }
 0x29c   : > { %v889_v39 = vadd.f32 %v867_v36, %v841_v32  ;;  %v897_v40 = vmul.f32 %v841_v32, %v841_v32  ;;  %v898_v41 = vmul.f32 %v867_v36, %v867_v36  ;;  %885 = vst [vmem:[%s884_s7] sm:$0xff] %v841_v32  ;;  %v1142_v43 = vld [vmem:[%s975_s30 + $0x8] sm:$0xff]  ;;  %vm893_vm0 = vcmask 7168  }
 0x29d   : > { %886 = vst [vmem:[%s884_s7 + $0x8] sm:$0xff] %v867_v36  ;;  %v1145_v46 = vld [vmem:[%s978_s22 + $0x8] sm:$0xff] }
 0x29e   : > { %890 = vadd.xlane.f32.xlu0 %v889_v39  ;;  %v899_v42 = vadd.f32 %v898_v41, %v897_v40 }
 0x2a6   : > { %900 = vadd.xlane.f32.xlu0 %v899_v42 }
 0x311   : > { %v891_v44 = vpop.xlane.xlu0 %890 }
 0x312   : > { %v892_v45 = vadd.f32 %v1142_v43, %v891_v44 }
 0x314   : > { %1143 = vst.msk [vmem:[%s975_s30 + $0x8] sm:$0xff] %vm893_vm0, %v892_v45 }
 0x319   : > { %v901_v47 = vpop.xlane.xlu0 %900 }
 0x31a   : > { %v902_v48 = vadd.f32 %v1145_v46, %v901_v47 }
 0x31c   : > { %1146 = vst.msk [vmem:[%s978_s22 + $0x8] sm:$0xff] %vm893_vm0, %v902_v48 }
 0x31d PF: > { %s16_s25 = sadd.s32 1, %s1265_s25   ;;  %s1536_s8 = sld [smem:[#allocation6_spill]] }
 0x31e   : > { %p13_p11 = scmp.ge.s32.totalorder %s16_s25, 6   ;;  %s1537_s21 = smov %s1257_s23 }
 0x31f   : > { %s1538_s22 = smov %s1261_s24  ;;  %s1539_s23 = smov %s1542_s26 }
 0x320   :  { %15 = sbr.rel (!%p13_p11) target bundleno = 3 (0x3), region = 102 }
 0x323   : > { %s1540_s24 = smov %s1536_s8 }

</bundles_post_ra>
